<compile_context>
chip_gen: v7x
topology: tpu7x:2x2x1
jax: 0.10.0
libtpu: 0.0.40
codegen_flags: <defaults>
</compile_context>

<pallas_src>
import jax
import jax.numpy as jnp
from jax import lax
from jax.experimental import pallas as pl
from jax.experimental.pallas import tpu as pltpu


# ----------------------------- Pallas kernel --------------------------------

def _lstm_fc_kernel(x_ref, wx_ref, wh_ref, b_ref, wfc_ref, bfc_ref, out_ref):
    S, B, I = x_ref.shape
    H4 = wx_ref.shape[1]
    H = H4 // 4
    O = wfc_ref.shape[1]

    # Hoist resident weights into vregs once (not per timestep).
    wx = wx_ref[...]       # (I, 4H)
    wh = wh_ref[...]       # (H, 4H)
    b = b_ref[...]         # (1, 4H)
    wfc = wfc_ref[...]     # (H, O)
    bfc = bfc_ref[...]     # (1, O)

    h = jnp.zeros((B, H), jnp.float32)
    c = jnp.zeros((B, H), jnp.float32)

    # Fully unrolled recurrence; h/c live in registers across iterations.
    for t in range(S):
        x_t = x_ref[t]                                   # (B, I), static slice

        # gates = x_t @ Wx + h @ Wh + b, as VPU broadcast-multiply-adds
        # (K = I + H = 6 -> 6 FMAs; no MXU push/pop on the critical path).
        pre = jnp.broadcast_to(b, (B, H4))
        for k in range(I):
            pre = pre + x_t[:, k:k + 1] * wx[k:k + 1, :]
        for k in range(H):
            pre = pre + h[:, k:k + 1] * wh[k:k + 1, :]

        # One sigmoid pass and one tanh pass over the fused (B, 4H) slab.
        sig = jax.nn.sigmoid(pre)
        tnh = jnp.tanh(pre)
        i_g = sig[:, 0 * H:1 * H]     # PyTorch gate order: i, f, g, o
        f_g = sig[:, 1 * H:2 * H]
        g_g = tnh[:, 2 * H:3 * H]
        o_g = sig[:, 3 * H:4 * H]

        c = f_g * c + i_g * g_g
        h = o_g * jnp.tanh(c)

    # Final Linear (H -> O) as VPU FMAs on the last hidden state.
    out = jnp.broadcast_to(bfc, (B, O))
    for k in range(H):
        out = out + h[:, k:k + 1] * wfc[k:k + 1, :]
    out_ref[...] = out


def sigma_delta_lstm_forward(x, params):
    """x: (S, B, I) float32.  Returns (B, 3) float32."""
    S, B, I = x.shape
    w_x = params["w_x"]        # (I, 4H)   fused gate weights (i|f|g|o columns)
    w_h = params["w_h"]        # (H, 4H)
    b = params["b"]            # (1, 4H)   b_ih + b_hh
    w_fc_t = params["w_fc_t"]  # (H, O)
    b_fc = params["b_fc"]      # (1, O)
    O = w_fc_t.shape[1]

    vmem = lambda: pl.BlockSpec(memory_space=pltpu.MemorySpace.VMEM)

    return pl.pallas_call(
        _lstm_fc_kernel,
        out_shape=jax.ShapeDtypeStruct((B, O), jnp.float32),
        in_specs=[vmem(), vmem(), vmem(), vmem(), vmem(), vmem()],
        out_specs=vmem(),
    )(x, w_x, w_h, b, w_fc_t, b_fc)


# ------------------------ parameter setup (plain JAX) ------------------------

def init_params(key, input_size=3, hidden_size=3, out_size=3):
    """Deterministic init mirroring PyTorch default uniform(-1/sqrt(H), 1/sqrt(H))."""
    k = 1.0 / jnp.sqrt(jnp.float32(hidden_size))
    keys = jax.random.split(key, 6)
    w_ih = jax.random.uniform(keys[0], (4 * hidden_size, input_size),
                              jnp.float32, -k, k)      # PyTorch weight_ih_l0
    w_hh = jax.random.uniform(keys[1], (4 * hidden_size, hidden_size),
                              jnp.float32, -k, k)      # PyTorch weight_hh_l0
    b_ih = jax.random.uniform(keys[2], (4 * hidden_size,), jnp.float32, -k, k)
    b_hh = jax.random.uniform(keys[3], (4 * hidden_size,), jnp.float32, -k, k)
    w_fc = jax.random.uniform(keys[4], (out_size, hidden_size),
                              jnp.float32, -k, k)      # PyTorch Linear weight
    b_fc = jax.random.uniform(keys[5], (out_size,), jnp.float32, -k, k)

    # Fused packing: columns of (I, 4H) / (H, 4H) keep PyTorch's (i, f, g, o)
    # gate order; 4H = 12 lanes so everything sits in a single vreg.
    w_x = w_ih.T                                        # (I, 4H)
    w_h = w_hh.T                                        # (H, 4H)
    b = (b_ih + b_hh).reshape(1, 4 * hidden_size)       # (1, 4H)

    raw = dict(w_ih=w_ih, w_hh=w_hh, b_ih=b_ih, b_hh=b_hh, w_fc=w_fc, b_fc=b_fc)
    packed = dict(w_x=w_x, w_h=w_h, b=b,
                  w_fc_t=w_fc.T, b_fc=b_fc.reshape(1, out_size))
    return raw, packed


def reference_forward(x, raw):
    """Pure-JAX reference replicating PyTorch LSTM + Linear semantics."""
    S, B, I = x.shape
    H = raw["w_hh"].shape[1]

    def step(carry, x_t):
        h, c = carry
        gates = (x_t @ raw["w_ih"].T + h @ raw["w_hh"].T
                 + raw["b_ih"] + raw["b_hh"])            # (B, 4H)
        i = jax.nn.sigmoid(gates[:, 0 * H:1 * H])
        f = jax.nn.sigmoid(gates[:, 1 * H:2 * H])
        g = jnp.tanh(gates[:, 2 * H:3 * H])
        o = jax.nn.sigmoid(gates[:, 3 * H:4 * H])
        c_new = f * c + i * g
        h_new = o * jnp.tanh(c_new)
        return (h_new, c_new), None

    h0 = jnp.zeros((B, H), jnp.float32)
    c0 = jnp.zeros((B, H), jnp.float32)
    (h_last, _), _ = lax.scan(step, (h0, c0), x)
    return h_last @ raw["w_fc"].T + raw["b_fc"]


# --------------------------------- main --------------------------------------

if __name__ == "__main__":
    HIDDEN_SIZE = 3
    INPUT_SIZE = 3
    OUT_SIZE = 3
    SEQ_LEN = 8
    BATCH = 2

    key = jax.random.PRNGKey(0)
    k_param, k_x = jax.random.split(key)
    raw, packed = init_params(k_param, INPUT_SIZE, HIDDEN_SIZE, OUT_SIZE)

    # layout: (seq, batch, input) like PyTorch nn.LSTM default (batch_first=False)
    x = jax.random.normal(k_x, (SEQ_LEN, BATCH, INPUT_SIZE), jnp.float32)

    # TODO(synk): module name suggests sigma-delta input encoding, but the
    # reference forward() is a plain LSTM + Linear; that is what is implemented.
    out = sigma_delta_lstm_forward(x, packed)
    out = jax.block_until_ready(out)

    ref = jax.block_until_ready(reference_forward(x, raw))
    assert out.shape == (BATCH, OUT_SIZE)
    assert jnp.allclose(out, ref, atol=1e-5, rtol=1e-5), (out, ref)

    print("KERNEL_OK")
</pallas_src>

<mosaic_0001>
module attributes {stable_mosaic.version = 11 : i64} {
  func.func @_lstm_fc_kernel(%arg0: memref<8x2x3xf32, #tpu.memory_space<vmem>>, %arg1: memref<3x12xf32, #tpu.memory_space<vmem>>, %arg2: memref<3x12xf32, #tpu.memory_space<vmem>>, %arg3: memref<1x12xf32, #tpu.memory_space<vmem>>, %arg4: memref<3x3xf32, #tpu.memory_space<vmem>>, %arg5: memref<1x3xf32, #tpu.memory_space<vmem>>, %arg6: memref<2x3xf32, #tpu.memory_space<vmem>>) attributes {dimension_semantics = [], scalar_prefetch = 0 : i64, scratch_operands = 0 : i64, tpu.core_type = #tpu.core_type<tc>} {
    %c0 = arith.constant 0 : index
    %c0_0 = arith.constant 0 : index
    %0 = vector.load %arg1[%c0, %c0_0] : memref<3x12xf32, #tpu.memory_space<vmem>>, vector<3x12xf32>
    %c0_1 = arith.constant 0 : index
    %c0_2 = arith.constant 0 : index
    %1 = vector.load %arg2[%c0_1, %c0_2] : memref<3x12xf32, #tpu.memory_space<vmem>>, vector<3x12xf32>
    %c0_3 = arith.constant 0 : index
    %c0_4 = arith.constant 0 : index
    %2 = vector.load %arg3[%c0_3, %c0_4] : memref<1x12xf32, #tpu.memory_space<vmem>>, vector<1x12xf32>
    %c0_5 = arith.constant 0 : index
    %c0_6 = arith.constant 0 : index
    %3 = vector.load %arg4[%c0_5, %c0_6] : memref<3x3xf32, #tpu.memory_space<vmem>>, vector<3x3xf32>
    %c0_7 = arith.constant 0 : index
    %c0_8 = arith.constant 0 : index
    %4 = vector.load %arg5[%c0_7, %c0_8] : memref<1x3xf32, #tpu.memory_space<vmem>>, vector<1x3xf32>
    %cst = arith.constant 0.000000e+00 : f32
    %5 = vector.broadcast %cst : f32 to vector<2x3xf32>
    %cst_9 = arith.constant 0.000000e+00 : f32
    %6 = vector.broadcast %cst_9 : f32 to vector<2x3xf32>
    %c0_10 = arith.constant 0 : index
    %c0_11 = arith.constant 0 : index
    %c0_12 = arith.constant 0 : index
    %7 = vector.load %arg0[%c0_10, %c0_11, %c0_12] : memref<8x2x3xf32, #tpu.memory_space<vmem>>, vector<1x2x3xf32>
    %8 = vector.shape_cast %7 : vector<1x2x3xf32> to vector<2x3xf32>
    %9 = vector.shape_cast %2 : vector<1x12xf32> to vector<1x12xf32>
    %10 = vector.broadcast %9 : vector<1x12xf32> to vector<2x12xf32>
    %11 = vector.extract_strided_slice %8 {offsets = [0, 0], sizes = [2, 1], strides = [1, 1]} : vector<2x3xf32> to vector<2x1xf32>
    %12 = vector.extract_strided_slice %0 {offsets = [0, 0], sizes = [1, 12], strides = [1, 1]} : vector<3x12xf32> to vector<1x12xf32>
    %13 = vector.broadcast %11 : vector<2x1xf32> to vector<2x12xf32>
    %14 = vector.broadcast %12 : vector<1x12xf32> to vector<2x12xf32>
    %15 = arith.mulf %13, %14 : vector<2x12xf32>
    %16 = arith.addf %10, %15 : vector<2x12xf32>
    %17 = vector.extract_strided_slice %8 {offsets = [0, 1], sizes = [2, 1], strides = [1, 1]} : vector<2x3xf32> to vector<2x1xf32>
    %18 = vector.extract_strided_slice %0 {offsets = [1, 0], sizes = [1, 12], strides = [1, 1]} : vector<3x12xf32> to vector<1x12xf32>
    %19 = vector.broadcast %17 : vector<2x1xf32> to vector<2x12xf32>
    %20 = vector.broadcast %18 : vector<1x12xf32> to vector<2x12xf32>
    %21 = arith.mulf %19, %20 : vector<2x12xf32>
    %22 = arith.addf %16, %21 : vector<2x12xf32>
    %23 = vector.extract_strided_slice %8 {offsets = [0, 2], sizes = [2, 1], strides = [1, 1]} : vector<2x3xf32> to vector<2x1xf32>
    %24 = vector.extract_strided_slice %0 {offsets = [2, 0], sizes = [1, 12], strides = [1, 1]} : vector<3x12xf32> to vector<1x12xf32>
    %25 = vector.broadcast %23 : vector<2x1xf32> to vector<2x12xf32>
    %26 = vector.broadcast %24 : vector<1x12xf32> to vector<2x12xf32>
    %27 = arith.mulf %25, %26 : vector<2x12xf32>
    %28 = arith.addf %22, %27 : vector<2x12xf32>
    %29 = vector.extract_strided_slice %5 {offsets = [0, 0], sizes = [2, 1], strides = [1, 1]} : vector<2x3xf32> to vector<2x1xf32>
    %30 = vector.extract_strided_slice %1 {offsets = [0, 0], sizes = [1, 12], strides = [1, 1]} : vector<3x12xf32> to vector<1x12xf32>
    %31 = vector.broadcast %29 : vector<2x1xf32> to vector<2x12xf32>
    %32 = vector.broadcast %30 : vector<1x12xf32> to vector<2x12xf32>
    %33 = arith.mulf %31, %32 : vector<2x12xf32>
    %34 = arith.addf %28, %33 : vector<2x12xf32>
    %35 = vector.extract_strided_slice %5 {offsets = [0, 1], sizes = [2, 1], strides = [1, 1]} : vector<2x3xf32> to vector<2x1xf32>
    %36 = vector.extract_strided_slice %1 {offsets = [1, 0], sizes = [1, 12], strides = [1, 1]} : vector<3x12xf32> to vector<1x12xf32>
    %37 = vector.broadcast %35 : vector<2x1xf32> to vector<2x12xf32>
    %38 = vector.broadcast %36 : vector<1x12xf32> to vector<2x12xf32>
    %39 = arith.mulf %37, %38 : vector<2x12xf32>
    %40 = arith.addf %34, %39 : vector<2x12xf32>
    %41 = vector.extract_strided_slice %5 {offsets = [0, 2], sizes = [2, 1], strides = [1, 1]} : vector<2x3xf32> to vector<2x1xf32>
    %42 = vector.extract_strided_slice %1 {offsets = [2, 0], sizes = [1, 12], strides = [1, 1]} : vector<3x12xf32> to vector<1x12xf32>
    %43 = vector.broadcast %41 : vector<2x1xf32> to vector<2x12xf32>
    %44 = vector.broadcast %42 : vector<1x12xf32> to vector<2x12xf32>
    %45 = arith.mulf %43, %44 : vector<2x12xf32>
    %46 = arith.addf %40, %45 : vector<2x12xf32>
    %47 = arith.negf %46 : vector<2x12xf32>
    %48 = math.exp %47 : vector<2x12xf32>
    %cst_13 = arith.constant 1.000000e+00 : f32
    %49 = vector.broadcast %cst_13 : f32 to vector<2x12xf32>
    %50 = arith.addf %49, %48 : vector<2x12xf32>
    %51 = arith.divf %49, %50 : vector<2x12xf32>
    %52 = math.tanh %46 : vector<2x12xf32>
    %53 = vector.extract_strided_slice %51 {offsets = [0, 0], sizes = [2, 3], strides = [1, 1]} : vector<2x12xf32> to vector<2x3xf32>
    %54 = vector.extract_strided_slice %51 {offsets = [0, 3], sizes = [2, 3], strides = [1, 1]} : vector<2x12xf32> to vector<2x3xf32>
    %55 = vector.extract_strided_slice %52 {offsets = [0, 6], sizes = [2, 3], strides = [1, 1]} : vector<2x12xf32> to vector<2x3xf32>
    %56 = vector.extract_strided_slice %51 {offsets = [0, 9], sizes = [2, 3], strides = [1, 1]} : vector<2x12xf32> to vector<2x3xf32>
    %57 = arith.mulf %54, %6 : vector<2x3xf32>
    %58 = arith.mulf %53, %55 : vector<2x3xf32>
    %59 = arith.addf %57, %58 : vector<2x3xf32>
    %60 = math.tanh %59 : vector<2x3xf32>
    %61 = arith.mulf %56, %60 : vector<2x3xf32>
    %c1 = arith.constant 1 : index
    %c0_14 = arith.constant 0 : index
    %c0_15 = arith.constant 0 : index
    %62 = vector.load %arg0[%c1, %c0_14, %c0_15] : memref<8x2x3xf32, #tpu.memory_space<vmem>>, vector<1x2x3xf32>
    %63 = vector.shape_cast %62 : vector<1x2x3xf32> to vector<2x3xf32>
    %64 = vector.shape_cast %2 : vector<1x12xf32> to vector<1x12xf32>
    %65 = vector.broadcast %64 : vector<1x12xf32> to vector<2x12xf32>
    %66 = vector.extract_strided_slice %63 {offsets = [0, 0], sizes = [2, 1], strides = [1, 1]} : vector<2x3xf32> to vector<2x1xf32>
    %67 = vector.extract_strided_slice %0 {offsets = [0, 0], sizes = [1, 12], strides = [1, 1]} : vector<3x12xf32> to vector<1x12xf32>
    %68 = vector.broadcast %66 : vector<2x1xf32> to vector<2x12xf32>
    %69 = vector.broadcast %67 : vector<1x12xf32> to vector<2x12xf32>
    %70 = arith.mulf %68, %69 : vector<2x12xf32>
    %71 = arith.addf %65, %70 : vector<2x12xf32>
    %72 = vector.extract_strided_slice %63 {offsets = [0, 1], sizes = [2, 1], strides = [1, 1]} : vector<2x3xf32> to vector<2x1xf32>
    %73 = vector.extract_strided_slice %0 {offsets = [1, 0], sizes = [1, 12], strides = [1, 1]} : vector<3x12xf32> to vector<1x12xf32>
    %74 = vector.broadcast %72 : vector<2x1xf32> to vector<2x12xf32>
    %75 = vector.broadcast %73 : vector<1x12xf32> to vector<2x12xf32>
    %76 = arith.mulf %74, %75 : vector<2x12xf32>
    %77 = arith.addf %71, %76 : vector<2x12xf32>
    %78 = vector.extract_strided_slice %63 {offsets = [0, 2], sizes = [2, 1], strides = [1, 1]} : vector<2x3xf32> to vector<2x1xf32>
    %79 = vector.extract_strided_slice %0 {offsets = [2, 0], sizes = [1, 12], strides = [1, 1]} : vector<3x12xf32> to vector<1x12xf32>
    %80 = vector.broadcast %78 : vector<2x1xf32> to vector<2x12xf32>
    %81 = vector.broadcast %79 : vector<1x12xf32> to vector<2x12xf32>
    %82 = arith.mulf %80, %81 : vector<2x12xf32>
    %83 = arith.addf %77, %82 : vector<2x12xf32>
    %84 = vector.extract_strided_slice %61 {offsets = [0, 0], sizes = [2, 1], strides = [1, 1]} : vector<2x3xf32> to vector<2x1xf32>
    %85 = vector.extract_strided_slice %1 {offsets = [0, 0], sizes = [1, 12], strides = [1, 1]} : vector<3x12xf32> to vector<1x12xf32>
    %86 = vector.broadcast %84 : vector<2x1xf32> to vector<2x12xf32>
    %87 = vector.broadcast %85 : vector<1x12xf32> to vector<2x12xf32>
    %88 = arith.mulf %86, %87 : vector<2x12xf32>
    %89 = arith.addf %83, %88 : vector<2x12xf32>
    %90 = vector.extract_strided_slice %61 {offsets = [0, 1], sizes = [2, 1], strides = [1, 1]} : vector<2x3xf32> to vector<2x1xf32>
    %91 = vector.extract_strided_slice %1 {offsets = [1, 0], sizes = [1, 12], strides = [1, 1]} : vector<3x12xf32> to vector<1x12xf32>
    %92 = vector.broadcast %90 : vector<2x1xf32> to vector<2x12xf32>
    %93 = vector.broadcast %91 : vector<1x12xf32> to vector<2x12xf32>
    %94 = arith.mulf %92, %93 : vector<2x12xf32>
    %95 = arith.addf %89, %94 : vector<2x12xf32>
    %96 = vector.extract_strided_slice %61 {offsets = [0, 2], sizes = [2, 1], strides = [1, 1]} : vector<2x3xf32> to vector<2x1xf32>
    %97 = vector.extract_strided_slice %1 {offsets = [2, 0], sizes = [1, 12], strides = [1, 1]} : vector<3x12xf32> to vector<1x12xf32>
    %98 = vector.broadcast %96 : vector<2x1xf32> to vector<2x12xf32>
    %99 = vector.broadcast %97 : vector<1x12xf32> to vector<2x12xf32>
    %100 = arith.mulf %98, %99 : vector<2x12xf32>
    %101 = arith.addf %95, %100 : vector<2x12xf32>
    %102 = arith.negf %101 : vector<2x12xf32>
    %103 = math.exp %102 : vector<2x12xf32>
    %cst_16 = arith.constant 1.000000e+00 : f32
    %104 = vector.broadcast %cst_16 : f32 to vector<2x12xf32>
    %105 = arith.addf %104, %103 : vector<2x12xf32>
    %106 = arith.divf %104, %105 : vector<2x12xf32>
    %107 = math.tanh %101 : vector<2x12xf32>
    %108 = vector.extract_strided_slice %106 {offsets = [0, 0], sizes = [2, 3], strides = [1, 1]} : vector<2x12xf32> to vector<2x3xf32>
    %109 = vector.extract_strided_slice %106 {offsets = [0, 3], sizes = [2, 3], strides = [1, 1]} : vector<2x12xf32> to vector<2x3xf32>
    %110 = vector.extract_strided_slice %107 {offsets = [0, 6], sizes = [2, 3], strides = [1, 1]} : vector<2x12xf32> to vector<2x3xf32>
    %111 = vector.extract_strided_slice %106 {offsets = [0, 9], sizes = [2, 3], strides = [1, 1]} : vector<2x12xf32> to vector<2x3xf32>
    %112 = arith.mulf %109, %59 : vector<2x3xf32>
    %113 = arith.mulf %108, %110 : vector<2x3xf32>
    %114 = arith.addf %112, %113 : vector<2x3xf32>
    %115 = math.tanh %114 : vector<2x3xf32>
    %116 = arith.mulf %111, %115 : vector<2x3xf32>
    %c2 = arith.constant 2 : index
    %c0_17 = arith.constant 0 : index
    %c0_18 = arith.constant 0 : index
    %117 = vector.load %arg0[%c2, %c0_17, %c0_18] : memref<8x2x3xf32, #tpu.memory_space<vmem>>, vector<1x2x3xf32>
    %118 = vector.shape_cast %117 : vector<1x2x3xf32> to vector<2x3xf32>
    %119 = vector.shape_cast %2 : vector<1x12xf32> to vector<1x12xf32>
    %120 = vector.broadcast %119 : vector<1x12xf32> to vector<2x12xf32>
    %121 = vector.extract_strided_slice %118 {offsets = [0, 0], sizes = [2, 1], strides = [1, 1]} : vector<2x3xf32> to vector<2x1xf32>
    %122 = vector.extract_strided_slice %0 {offsets = [0, 0], sizes = [1, 12], strides = [1, 1]} : vector<3x12xf32> to vector<1x12xf32>
    %123 = vector.broadcast %121 : vector<2x1xf32> to vector<2x12xf32>
    %124 = vector.broadcast %122 : vector<1x12xf32> to vector<2x12xf32>
    %125 = arith.mulf %123, %124 : vector<2x12xf32>
    %126 = arith.addf %120, %125 : vector<2x12xf32>
    %127 = vector.extract_strided_slice %118 {offsets = [0, 1], sizes = [2, 1], strides = [1, 1]} : vector<2x3xf32> to vector<2x1xf32>
    %128 = vector.extract_strided_slice %0 {offsets = [1, 0], sizes = [1, 12], strides = [1, 1]} : vector<3x12xf32> to vector<1x12xf32>
    %129 = vector.broadcast %127 : vector<2x1xf32> to vector<2x12xf32>
    %130 = vector.broadcast %128 : vector<1x12xf32> to vector<2x12xf32>
    %131 = arith.mulf %129, %130 : vector<2x12xf32>
    %132 = arith.addf %126, %131 : vector<2x12xf32>
    %133 = vector.extract_strided_slice %118 {offsets = [0, 2], sizes = [2, 1], strides = [1, 1]} : vector<2x3xf32> to vector<2x1xf32>
    %134 = vector.extract_strided_slice %0 {offsets = [2, 0], sizes = [1, 12], strides = [1, 1]} : vector<3x12xf32> to vector<1x12xf32>
    %135 = vector.broadcast %133 : vector<2x1xf32> to vector<2x12xf32>
    %136 = vector.broadcast %134 : vector<1x12xf32> to vector<2x12xf32>
    %137 = arith.mulf %135, %136 : vector<2x12xf32>
    %138 = arith.addf %132, %137 : vector<2x12xf32>
    %139 = vector.extract_strided_slice %116 {offsets = [0, 0], sizes = [2, 1], strides = [1, 1]} : vector<2x3xf32> to vector<2x1xf32>
    %140 = vector.extract_strided_slice %1 {offsets = [0, 0], sizes = [1, 12], strides = [1, 1]} : vector<3x12xf32> to vector<1x12xf32>
    %141 = vector.broadcast %139 : vector<2x1xf32> to vector<2x12xf32>
    %142 = vector.broadcast %140 : vector<1x12xf32> to vector<2x12xf32>
    %143 = arith.mulf %141, %142 : vector<2x12xf32>
    %144 = arith.addf %138, %143 : vector<2x12xf32>
    %145 = vector.extract_strided_slice %116 {offsets = [0, 1], sizes = [2, 1], strides = [1, 1]} : vector<2x3xf32> to vector<2x1xf32>
    %146 = vector.extract_strided_slice %1 {offsets = [1, 0], sizes = [1, 12], strides = [1, 1]} : vector<3x12xf32> to vector<1x12xf32>
    %147 = vector.broadcast %145 : vector<2x1xf32> to vector<2x12xf32>
    %148 = vector.broadcast %146 : vector<1x12xf32> to vector<2x12xf32>
    %149 = arith.mulf %147, %148 : vector<2x12xf32>
    %150 = arith.addf %144, %149 : vector<2x12xf32>
    %151 = vector.extract_strided_slice %116 {offsets = [0, 2], sizes = [2, 1], strides = [1, 1]} : vector<2x3xf32> to vector<2x1xf32>
    %152 = vector.extract_strided_slice %1 {offsets = [2, 0], sizes = [1, 12], strides = [1, 1]} : vector<3x12xf32> to vector<1x12xf32>
    %153 = vector.broadcast %151 : vector<2x1xf32> to vector<2x12xf32>
    %154 = vector.broadcast %152 : vector<1x12xf32> to vector<2x12xf32>
    %155 = arith.mulf %153, %154 : vector<2x12xf32>
    %156 = arith.addf %150, %155 : vector<2x12xf32>
    %157 = arith.negf %156 : vector<2x12xf32>
    %158 = math.exp %157 : vector<2x12xf32>
    %cst_19 = arith.constant 1.000000e+00 : f32
    %159 = vector.broadcast %cst_19 : f32 to vector<2x12xf32>
    %160 = arith.addf %159, %158 : vector<2x12xf32>
    %161 = arith.divf %159, %160 : vector<2x12xf32>
    %162 = math.tanh %156 : vector<2x12xf32>
    %163 = vector.extract_strided_slice %161 {offsets = [0, 0], sizes = [2, 3], strides = [1, 1]} : vector<2x12xf32> to vector<2x3xf32>
    %164 = vector.extract_strided_slice %161 {offsets = [0, 3], sizes = [2, 3], strides = [1, 1]} : vector<2x12xf32> to vector<2x3xf32>
    %165 = vector.extract_strided_slice %162 {offsets = [0, 6], sizes = [2, 3], strides = [1, 1]} : vector<2x12xf32> to vector<2x3xf32>
    %166 = vector.extract_strided_slice %161 {offsets = [0, 9], sizes = [2, 3], strides = [1, 1]} : vector<2x12xf32> to vector<2x3xf32>
    %167 = arith.mulf %164, %114 : vector<2x3xf32>
    %168 = arith.mulf %163, %165 : vector<2x3xf32>
    %169 = arith.addf %167, %168 : vector<2x3xf32>
    %170 = math.tanh %169 : vector<2x3xf32>
    %171 = arith.mulf %166, %170 : vector<2x3xf32>
    %c3 = arith.constant 3 : index
    %c0_20 = arith.constant 0 : index
    %c0_21 = arith.constant 0 : index
    %172 = vector.load %arg0[%c3, %c0_20, %c0_21] : memref<8x2x3xf32, #tpu.memory_space<vmem>>, vector<1x2x3xf32>
    %173 = vector.shape_cast %172 : vector<1x2x3xf32> to vector<2x3xf32>
    %174 = vector.shape_cast %2 : vector<1x12xf32> to vector<1x12xf32>
    %175 = vector.broadcast %174 : vector<1x12xf32> to vector<2x12xf32>
    %176 = vector.extract_strided_slice %173 {offsets = [0, 0], sizes = [2, 1], strides = [1, 1]} : vector<2x3xf32> to vector<2x1xf32>
    %177 = vector.extract_strided_slice %0 {offsets = [0, 0], sizes = [1, 12], strides = [1, 1]} : vector<3x12xf32> to vector<1x12xf32>
    %178 = vector.broadcast %176 : vector<2x1xf32> to vector<2x12xf32>
    %179 = vector.broadcast %177 : vector<1x12xf32> to vector<2x12xf32>
    %180 = arith.mulf %178, %179 : vector<2x12xf32>
    %181 = arith.addf %175, %180 : vector<2x12xf32>
    %182 = vector.extract_strided_slice %173 {offsets = [0, 1], sizes = [2, 1], strides = [1, 1]} : vector<2x3xf32> to vector<2x1xf32>
    %183 = vector.extract_strided_slice %0 {offsets = [1, 0], sizes = [1, 12], strides = [1, 1]} : vector<3x12xf32> to vector<1x12xf32>
    %184 = vector.broadcast %182 : vector<2x1xf32> to vector<2x12xf32>
    %185 = vector.broadcast %183 : vector<1x12xf32> to vector<2x12xf32>
    %186 = arith.mulf %184, %185 : vector<2x12xf32>
    %187 = arith.addf %181, %186 : vector<2x12xf32>
    %188 = vector.extract_strided_slice %173 {offsets = [0, 2], sizes = [2, 1], strides = [1, 1]} : vector<2x3xf32> to vector<2x1xf32>
    %189 = vector.extract_strided_slice %0 {offsets = [2, 0], sizes = [1, 12], strides = [1, 1]} : vector<3x12xf32> to vector<1x12xf32>
    %190 = vector.broadcast %188 : vector<2x1xf32> to vector<2x12xf32>
    %191 = vector.broadcast %189 : vector<1x12xf32> to vector<2x12xf32>
    %192 = arith.mulf %190, %191 : vector<2x12xf32>
    %193 = arith.addf %187, %192 : vector<2x12xf32>
    %194 = vector.extract_strided_slice %171 {offsets = [0, 0], sizes = [2, 1], strides = [1, 1]} : vector<2x3xf32> to vector<2x1xf32>
    %195 = vector.extract_strided_slice %1 {offsets = [0, 0], sizes = [1, 12], strides = [1, 1]} : vector<3x12xf32> to vector<1x12xf32>
    %196 = vector.broadcast %194 : vector<2x1xf32> to vector<2x12xf32>
    %197 = vector.broadcast %195 : vector<1x12xf32> to vector<2x12xf32>
    %198 = arith.mulf %196, %197 : vector<2x12xf32>
    %199 = arith.addf %193, %198 : vector<2x12xf32>
    %200 = vector.extract_strided_slice %171 {offsets = [0, 1], sizes = [2, 1], strides = [1, 1]} : vector<2x3xf32> to vector<2x1xf32>
    %201 = vector.extract_strided_slice %1 {offsets = [1, 0], sizes = [1, 12], strides = [1, 1]} : vector<3x12xf32> to vector<1x12xf32>
    %202 = vector.broadcast %200 : vector<2x1xf32> to vector<2x12xf32>
    %203 = vector.broadcast %201 : vector<1x12xf32> to vector<2x12xf32>
    %204 = arith.mulf %202, %203 : vector<2x12xf32>
    %205 = arith.addf %199, %204 : vector<2x12xf32>
    %206 = vector.extract_strided_slice %171 {offsets = [0, 2], sizes = [2, 1], strides = [1, 1]} : vector<2x3xf32> to vector<2x1xf32>
    %207 = vector.extract_strided_slice %1 {offsets = [2, 0], sizes = [1, 12], strides = [1, 1]} : vector<3x12xf32> to vector<1x12xf32>
    %208 = vector.broadcast %206 : vector<2x1xf32> to vector<2x12xf32>
    %209 = vector.broadcast %207 : vector<1x12xf32> to vector<2x12xf32>
    %210 = arith.mulf %208, %209 : vector<2x12xf32>
    %211 = arith.addf %205, %210 : vector<2x12xf32>
    %212 = arith.negf %211 : vector<2x12xf32>
    %213 = math.exp %212 : vector<2x12xf32>
    %cst_22 = arith.constant 1.000000e+00 : f32
    %214 = vector.broadcast %cst_22 : f32 to vector<2x12xf32>
    %215 = arith.addf %214, %213 : vector<2x12xf32>
    %216 = arith.divf %214, %215 : vector<2x12xf32>
    %217 = math.tanh %211 : vector<2x12xf32>
    %218 = vector.extract_strided_slice %216 {offsets = [0, 0], sizes = [2, 3], strides = [1, 1]} : vector<2x12xf32> to vector<2x3xf32>
    %219 = vector.extract_strided_slice %216 {offsets = [0, 3], sizes = [2, 3], strides = [1, 1]} : vector<2x12xf32> to vector<2x3xf32>
    %220 = vector.extract_strided_slice %217 {offsets = [0, 6], sizes = [2, 3], strides = [1, 1]} : vector<2x12xf32> to vector<2x3xf32>
    %221 = vector.extract_strided_slice %216 {offsets = [0, 9], sizes = [2, 3], strides = [1, 1]} : vector<2x12xf32> to vector<2x3xf32>
    %222 = arith.mulf %219, %169 : vector<2x3xf32>
    %223 = arith.mulf %218, %220 : vector<2x3xf32>
    %224 = arith.addf %222, %223 : vector<2x3xf32>
    %225 = math.tanh %224 : vector<2x3xf32>
    %226 = arith.mulf %221, %225 : vector<2x3xf32>
    %c4 = arith.constant 4 : index
    %c0_23 = arith.constant 0 : index
    %c0_24 = arith.constant 0 : index
    %227 = vector.load %arg0[%c4, %c0_23, %c0_24] : memref<8x2x3xf32, #tpu.memory_space<vmem>>, vector<1x2x3xf32>
    %228 = vector.shape_cast %227 : vector<1x2x3xf32> to vector<2x3xf32>
    %229 = vector.shape_cast %2 : vector<1x12xf32> to vector<1x12xf32>
    %230 = vector.broadcast %229 : vector<1x12xf32> to vector<2x12xf32>
    %231 = vector.extract_strided_slice %228 {offsets = [0, 0], sizes = [2, 1], strides = [1, 1]} : vector<2x3xf32> to vector<2x1xf32>
    %232 = vector.extract_strided_slice %0 {offsets = [0, 0], sizes = [1, 12], strides = [1, 1]} : vector<3x12xf32> to vector<1x12xf32>
    %233 = vector.broadcast %231 : vector<2x1xf32> to vector<2x12xf32>
    %234 = vector.broadcast %232 : vector<1x12xf32> to vector<2x12xf32>
    %235 = arith.mulf %233, %234 : vector<2x12xf32>
    %236 = arith.addf %230, %235 : vector<2x12xf32>
    %237 = vector.extract_strided_slice %228 {offsets = [0, 1], sizes = [2, 1], strides = [1, 1]} : vector<2x3xf32> to vector<2x1xf32>
    %238 = vector.extract_strided_slice %0 {offsets = [1, 0], sizes = [1, 12], strides = [1, 1]} : vector<3x12xf32> to vector<1x12xf32>
    %239 = vector.broadcast %237 : vector<2x1xf32> to vector<2x12xf32>
    %240 = vector.broadcast %238 : vector<1x12xf32> to vector<2x12xf32>
    %241 = arith.mulf %239, %240 : vector<2x12xf32>
    %242 = arith.addf %236, %241 : vector<2x12xf32>
    %243 = vector.extract_strided_slice %228 {offsets = [0, 2], sizes = [2, 1], strides = [1, 1]} : vector<2x3xf32> to vector<2x1xf32>
    %244 = vector.extract_strided_slice %0 {offsets = [2, 0], sizes = [1, 12], strides = [1, 1]} : vector<3x12xf32> to vector<1x12xf32>
    %245 = vector.broadcast %243 : vector<2x1xf32> to vector<2x12xf32>
    %246 = vector.broadcast %244 : vector<1x12xf32> to vector<2x12xf32>
    %247 = arith.mulf %245, %246 : vector<2x12xf32>
    %248 = arith.addf %242, %247 : vector<2x12xf32>
    %249 = vector.extract_strided_slice %226 {offsets = [0, 0], sizes = [2, 1], strides = [1, 1]} : vector<2x3xf32> to vector<2x1xf32>
    %250 = vector.extract_strided_slice %1 {offsets = [0, 0], sizes = [1, 12], strides = [1, 1]} : vector<3x12xf32> to vector<1x12xf32>
    %251 = vector.broadcast %249 : vector<2x1xf32> to vector<2x12xf32>
    %252 = vector.broadcast %250 : vector<1x12xf32> to vector<2x12xf32>
    %253 = arith.mulf %251, %252 : vector<2x12xf32>
    %254 = arith.addf %248, %253 : vector<2x12xf32>
    %255 = vector.extract_strided_slice %226 {offsets = [0, 1], sizes = [2, 1], strides = [1, 1]} : vector<2x3xf32> to vector<2x1xf32>
    %256 = vector.extract_strided_slice %1 {offsets = [1, 0], sizes = [1, 12], strides = [1, 1]} : vector<3x12xf32> to vector<1x12xf32>
    %257 = vector.broadcast %255 : vector<2x1xf32> to vector<2x12xf32>
    %258 = vector.broadcast %256 : vector<1x12xf32> to vector<2x12xf32>
    %259 = arith.mulf %257, %258 : vector<2x12xf32>
    %260 = arith.addf %254, %259 : vector<2x12xf32>
    %261 = vector.extract_strided_slice %226 {offsets = [0, 2], sizes = [2, 1], strides = [1, 1]} : vector<2x3xf32> to vector<2x1xf32>
    %262 = vector.extract_strided_slice %1 {offsets = [2, 0], sizes = [1, 12], strides = [1, 1]} : vector<3x12xf32> to vector<1x12xf32>
    %263 = vector.broadcast %261 : vector<2x1xf32> to vector<2x12xf32>
    %264 = vector.broadcast %262 : vector<1x12xf32> to vector<2x12xf32>
    %265 = arith.mulf %263, %264 : vector<2x12xf32>
    %266 = arith.addf %260, %265 : vector<2x12xf32>
    %267 = arith.negf %266 : vector<2x12xf32>
    %268 = math.exp %267 : vector<2x12xf32>
    %cst_25 = arith.constant 1.000000e+00 : f32
    %269 = vector.broadcast %cst_25 : f32 to vector<2x12xf32>
    %270 = arith.addf %269, %268 : vector<2x12xf32>
    %271 = arith.divf %269, %270 : vector<2x12xf32>
    %272 = math.tanh %266 : vector<2x12xf32>
    %273 = vector.extract_strided_slice %271 {offsets = [0, 0], sizes = [2, 3], strides = [1, 1]} : vector<2x12xf32> to vector<2x3xf32>
    %274 = vector.extract_strided_slice %271 {offsets = [0, 3], sizes = [2, 3], strides = [1, 1]} : vector<2x12xf32> to vector<2x3xf32>
    %275 = vector.extract_strided_slice %272 {offsets = [0, 6], sizes = [2, 3], strides = [1, 1]} : vector<2x12xf32> to vector<2x3xf32>
    %276 = vector.extract_strided_slice %271 {offsets = [0, 9], sizes = [2, 3], strides = [1, 1]} : vector<2x12xf32> to vector<2x3xf32>
    %277 = arith.mulf %274, %224 : vector<2x3xf32>
    %278 = arith.mulf %273, %275 : vector<2x3xf32>
    %279 = arith.addf %277, %278 : vector<2x3xf32>
    %280 = math.tanh %279 : vector<2x3xf32>
    %281 = arith.mulf %276, %280 : vector<2x3xf32>
    %c5 = arith.constant 5 : index
    %c0_26 = arith.constant 0 : index
    %c0_27 = arith.constant 0 : index
    %282 = vector.load %arg0[%c5, %c0_26, %c0_27] : memref<8x2x3xf32, #tpu.memory_space<vmem>>, vector<1x2x3xf32>
    %283 = vector.shape_cast %282 : vector<1x2x3xf32> to vector<2x3xf32>
    %284 = vector.shape_cast %2 : vector<1x12xf32> to vector<1x12xf32>
    %285 = vector.broadcast %284 : vector<1x12xf32> to vector<2x12xf32>
    %286 = vector.extract_strided_slice %283 {offsets = [0, 0], sizes = [2, 1], strides = [1, 1]} : vector<2x3xf32> to vector<2x1xf32>
    %287 = vector.extract_strided_slice %0 {offsets = [0, 0], sizes = [1, 12], strides = [1, 1]} : vector<3x12xf32> to vector<1x12xf32>
    %288 = vector.broadcast %286 : vector<2x1xf32> to vector<2x12xf32>
    %289 = vector.broadcast %287 : vector<1x12xf32> to vector<2x12xf32>
    %290 = arith.mulf %288, %289 : vector<2x12xf32>
    %291 = arith.addf %285, %290 : vector<2x12xf32>
    %292 = vector.extract_strided_slice %283 {offsets = [0, 1], sizes = [2, 1], strides = [1, 1]} : vector<2x3xf32> to vector<2x1xf32>
    %293 = vector.extract_strided_slice %0 {offsets = [1, 0], sizes = [1, 12], strides = [1, 1]} : vector<3x12xf32> to vector<1x12xf32>
    %294 = vector.broadcast %292 : vector<2x1xf32> to vector<2x12xf32>
    %295 = vector.broadcast %293 : vector<1x12xf32> to vector<2x12xf32>
    %296 = arith.mulf %294, %295 : vector<2x12xf32>
    %297 = arith.addf %291, %296 : vector<2x12xf32>
    %298 = vector.extract_strided_slice %283 {offsets = [0, 2], sizes = [2, 1], strides = [1, 1]} : vector<2x3xf32> to vector<2x1xf32>
    %299 = vector.extract_strided_slice %0 {offsets = [2, 0], sizes = [1, 12], strides = [1, 1]} : vector<3x12xf32> to vector<1x12xf32>
    %300 = vector.broadcast %298 : vector<2x1xf32> to vector<2x12xf32>
    %301 = vector.broadcast %299 : vector<1x12xf32> to vector<2x12xf32>
    %302 = arith.mulf %300, %301 : vector<2x12xf32>
    %303 = arith.addf %297, %302 : vector<2x12xf32>
    %304 = vector.extract_strided_slice %281 {offsets = [0, 0], sizes = [2, 1], strides = [1, 1]} : vector<2x3xf32> to vector<2x1xf32>
    %305 = vector.extract_strided_slice %1 {offsets = [0, 0], sizes = [1, 12], strides = [1, 1]} : vector<3x12xf32> to vector<1x12xf32>
    %306 = vector.broadcast %304 : vector<2x1xf32> to vector<2x12xf32>
    %307 = vector.broadcast %305 : vector<1x12xf32> to vector<2x12xf32>
    %308 = arith.mulf %306, %307 : vector<2x12xf32>
    %309 = arith.addf %303, %308 : vector<2x12xf32>
    %310 = vector.extract_strided_slice %281 {offsets = [0, 1], sizes = [2, 1], strides = [1, 1]} : vector<2x3xf32> to vector<2x1xf32>
    %311 = vector.extract_strided_slice %1 {offsets = [1, 0], sizes = [1, 12], strides = [1, 1]} : vector<3x12xf32> to vector<1x12xf32>
    %312 = vector.broadcast %310 : vector<2x1xf32> to vector<2x12xf32>
    %313 = vector.broadcast %311 : vector<1x12xf32> to vector<2x12xf32>
    %314 = arith.mulf %312, %313 : vector<2x12xf32>
    %315 = arith.addf %309, %314 : vector<2x12xf32>
    %316 = vector.extract_strided_slice %281 {offsets = [0, 2], sizes = [2, 1], strides = [1, 1]} : vector<2x3xf32> to vector<2x1xf32>
    %317 = vector.extract_strided_slice %1 {offsets = [2, 0], sizes = [1, 12], strides = [1, 1]} : vector<3x12xf32> to vector<1x12xf32>
    %318 = vector.broadcast %316 : vector<2x1xf32> to vector<2x12xf32>
    %319 = vector.broadcast %317 : vector<1x12xf32> to vector<2x12xf32>
    %320 = arith.mulf %318, %319 : vector<2x12xf32>
    %321 = arith.addf %315, %320 : vector<2x12xf32>
    %322 = arith.negf %321 : vector<2x12xf32>
    %323 = math.exp %322 : vector<2x12xf32>
    %cst_28 = arith.constant 1.000000e+00 : f32
    %324 = vector.broadcast %cst_28 : f32 to vector<2x12xf32>
    %325 = arith.addf %324, %323 : vector<2x12xf32>
    %326 = arith.divf %324, %325 : vector<2x12xf32>
    %327 = math.tanh %321 : vector<2x12xf32>
    %328 = vector.extract_strided_slice %326 {offsets = [0, 0], sizes = [2, 3], strides = [1, 1]} : vector<2x12xf32> to vector<2x3xf32>
    %329 = vector.extract_strided_slice %326 {offsets = [0, 3], sizes = [2, 3], strides = [1, 1]} : vector<2x12xf32> to vector<2x3xf32>
    %330 = vector.extract_strided_slice %327 {offsets = [0, 6], sizes = [2, 3], strides = [1, 1]} : vector<2x12xf32> to vector<2x3xf32>
    %331 = vector.extract_strided_slice %326 {offsets = [0, 9], sizes = [2, 3], strides = [1, 1]} : vector<2x12xf32> to vector<2x3xf32>
    %332 = arith.mulf %329, %279 : vector<2x3xf32>
    %333 = arith.mulf %328, %330 : vector<2x3xf32>
    %334 = arith.addf %332, %333 : vector<2x3xf32>
    %335 = math.tanh %334 : vector<2x3xf32>
    %336 = arith.mulf %331, %335 : vector<2x3xf32>
    %c6 = arith.constant 6 : index
    %c0_29 = arith.constant 0 : index
    %c0_30 = arith.constant 0 : index
    %337 = vector.load %arg0[%c6, %c0_29, %c0_30] : memref<8x2x3xf32, #tpu.memory_space<vmem>>, vector<1x2x3xf32>
    %338 = vector.shape_cast %337 : vector<1x2x3xf32> to vector<2x3xf32>
    %339 = vector.shape_cast %2 : vector<1x12xf32> to vector<1x12xf32>
    %340 = vector.broadcast %339 : vector<1x12xf32> to vector<2x12xf32>
    %341 = vector.extract_strided_slice %338 {offsets = [0, 0], sizes = [2, 1], strides = [1, 1]} : vector<2x3xf32> to vector<2x1xf32>
    %342 = vector.extract_strided_slice %0 {offsets = [0, 0], sizes = [1, 12], strides = [1, 1]} : vector<3x12xf32> to vector<1x12xf32>
    %343 = vector.broadcast %341 : vector<2x1xf32> to vector<2x12xf32>
    %344 = vector.broadcast %342 : vector<1x12xf32> to vector<2x12xf32>
    %345 = arith.mulf %343, %344 : vector<2x12xf32>
    %346 = arith.addf %340, %345 : vector<2x12xf32>
    %347 = vector.extract_strided_slice %338 {offsets = [0, 1], sizes = [2, 1], strides = [1, 1]} : vector<2x3xf32> to vector<2x1xf32>
    %348 = vector.extract_strided_slice %0 {offsets = [1, 0], sizes = [1, 12], strides = [1, 1]} : vector<3x12xf32> to vector<1x12xf32>
    %349 = vector.broadcast %347 : vector<2x1xf32> to vector<2x12xf32>
    %350 = vector.broadcast %348 : vector<1x12xf32> to vector<2x12xf32>
    %351 = arith.mulf %349, %350 : vector<2x12xf32>
    %352 = arith.addf %346, %351 : vector<2x12xf32>
    %353 = vector.extract_strided_slice %338 {offsets = [0, 2], sizes = [2, 1], strides = [1, 1]} : vector<2x3xf32> to vector<2x1xf32>
    %354 = vector.extract_strided_slice %0 {offsets = [2, 0], sizes = [1, 12], strides = [1, 1]} : vector<3x12xf32> to vector<1x12xf32>
    %355 = vector.broadcast %353 : vector<2x1xf32> to vector<2x12xf32>
    %356 = vector.broadcast %354 : vector<1x12xf32> to vector<2x12xf32>
    %357 = arith.mulf %355, %356 : vector<2x12xf32>
    %358 = arith.addf %352, %357 : vector<2x12xf32>
    %359 = vector.extract_strided_slice %336 {offsets = [0, 0], sizes = [2, 1], strides = [1, 1]} : vector<2x3xf32> to vector<2x1xf32>
    %360 = vector.extract_strided_slice %1 {offsets = [0, 0], sizes = [1, 12], strides = [1, 1]} : vector<3x12xf32> to vector<1x12xf32>
    %361 = vector.broadcast %359 : vector<2x1xf32> to vector<2x12xf32>
    %362 = vector.broadcast %360 : vector<1x12xf32> to vector<2x12xf32>
    %363 = arith.mulf %361, %362 : vector<2x12xf32>
    %364 = arith.addf %358, %363 : vector<2x12xf32>
    %365 = vector.extract_strided_slice %336 {offsets = [0, 1], sizes = [2, 1], strides = [1, 1]} : vector<2x3xf32> to vector<2x1xf32>
    %366 = vector.extract_strided_slice %1 {offsets = [1, 0], sizes = [1, 12], strides = [1, 1]} : vector<3x12xf32> to vector<1x12xf32>
    %367 = vector.broadcast %365 : vector<2x1xf32> to vector<2x12xf32>
    %368 = vector.broadcast %366 : vector<1x12xf32> to vector<2x12xf32>
    %369 = arith.mulf %367, %368 : vector<2x12xf32>
    %370 = arith.addf %364, %369 : vector<2x12xf32>
    %371 = vector.extract_strided_slice %336 {offsets = [0, 2], sizes = [2, 1], strides = [1, 1]} : vector<2x3xf32> to vector<2x1xf32>
    %372 = vector.extract_strided_slice %1 {offsets = [2, 0], sizes = [1, 12], strides = [1, 1]} : vector<3x12xf32> to vector<1x12xf32>
    %373 = vector.broadcast %371 : vector<2x1xf32> to vector<2x12xf32>
    %374 = vector.broadcast %372 : vector<1x12xf32> to vector<2x12xf32>
    %375 = arith.mulf %373, %374 : vector<2x12xf32>
    %376 = arith.addf %370, %375 : vector<2x12xf32>
    %377 = arith.negf %376 : vector<2x12xf32>
    %378 = math.exp %377 : vector<2x12xf32>
    %cst_31 = arith.constant 1.000000e+00 : f32
    %379 = vector.broadcast %cst_31 : f32 to vector<2x12xf32>
    %380 = arith.addf %379, %378 : vector<2x12xf32>
    %381 = arith.divf %379, %380 : vector<2x12xf32>
    %382 = math.tanh %376 : vector<2x12xf32>
    %383 = vector.extract_strided_slice %381 {offsets = [0, 0], sizes = [2, 3], strides = [1, 1]} : vector<2x12xf32> to vector<2x3xf32>
    %384 = vector.extract_strided_slice %381 {offsets = [0, 3], sizes = [2, 3], strides = [1, 1]} : vector<2x12xf32> to vector<2x3xf32>
    %385 = vector.extract_strided_slice %382 {offsets = [0, 6], sizes = [2, 3], strides = [1, 1]} : vector<2x12xf32> to vector<2x3xf32>
    %386 = vector.extract_strided_slice %381 {offsets = [0, 9], sizes = [2, 3], strides = [1, 1]} : vector<2x12xf32> to vector<2x3xf32>
    %387 = arith.mulf %384, %334 : vector<2x3xf32>
    %388 = arith.mulf %383, %385 : vector<2x3xf32>
    %389 = arith.addf %387, %388 : vector<2x3xf32>
    %390 = math.tanh %389 : vector<2x3xf32>
    %391 = arith.mulf %386, %390 : vector<2x3xf32>
    %c7 = arith.constant 7 : index
    %c0_32 = arith.constant 0 : index
    %c0_33 = arith.constant 0 : index
    %392 = vector.load %arg0[%c7, %c0_32, %c0_33] : memref<8x2x3xf32, #tpu.memory_space<vmem>>, vector<1x2x3xf32>
    %393 = vector.shape_cast %392 : vector<1x2x3xf32> to vector<2x3xf32>
    %394 = vector.shape_cast %2 : vector<1x12xf32> to vector<1x12xf32>
    %395 = vector.broadcast %394 : vector<1x12xf32> to vector<2x12xf32>
    %396 = vector.extract_strided_slice %393 {offsets = [0, 0], sizes = [2, 1], strides = [1, 1]} : vector<2x3xf32> to vector<2x1xf32>
    %397 = vector.extract_strided_slice %0 {offsets = [0, 0], sizes = [1, 12], strides = [1, 1]} : vector<3x12xf32> to vector<1x12xf32>
    %398 = vector.broadcast %396 : vector<2x1xf32> to vector<2x12xf32>
    %399 = vector.broadcast %397 : vector<1x12xf32> to vector<2x12xf32>
    %400 = arith.mulf %398, %399 : vector<2x12xf32>
    %401 = arith.addf %395, %400 : vector<2x12xf32>
    %402 = vector.extract_strided_slice %393 {offsets = [0, 1], sizes = [2, 1], strides = [1, 1]} : vector<2x3xf32> to vector<2x1xf32>
    %403 = vector.extract_strided_slice %0 {offsets = [1, 0], sizes = [1, 12], strides = [1, 1]} : vector<3x12xf32> to vector<1x12xf32>
    %404 = vector.broadcast %402 : vector<2x1xf32> to vector<2x12xf32>
    %405 = vector.broadcast %403 : vector<1x12xf32> to vector<2x12xf32>
    %406 = arith.mulf %404, %405 : vector<2x12xf32>
    %407 = arith.addf %401, %406 : vector<2x12xf32>
    %408 = vector.extract_strided_slice %393 {offsets = [0, 2], sizes = [2, 1], strides = [1, 1]} : vector<2x3xf32> to vector<2x1xf32>
    %409 = vector.extract_strided_slice %0 {offsets = [2, 0], sizes = [1, 12], strides = [1, 1]} : vector<3x12xf32> to vector<1x12xf32>
    %410 = vector.broadcast %408 : vector<2x1xf32> to vector<2x12xf32>
    %411 = vector.broadcast %409 : vector<1x12xf32> to vector<2x12xf32>
    %412 = arith.mulf %410, %411 : vector<2x12xf32>
    %413 = arith.addf %407, %412 : vector<2x12xf32>
    %414 = vector.extract_strided_slice %391 {offsets = [0, 0], sizes = [2, 1], strides = [1, 1]} : vector<2x3xf32> to vector<2x1xf32>
    %415 = vector.extract_strided_slice %1 {offsets = [0, 0], sizes = [1, 12], strides = [1, 1]} : vector<3x12xf32> to vector<1x12xf32>
    %416 = vector.broadcast %414 : vector<2x1xf32> to vector<2x12xf32>
    %417 = vector.broadcast %415 : vector<1x12xf32> to vector<2x12xf32>
    %418 = arith.mulf %416, %417 : vector<2x12xf32>
    %419 = arith.addf %413, %418 : vector<2x12xf32>
    %420 = vector.extract_strided_slice %391 {offsets = [0, 1], sizes = [2, 1], strides = [1, 1]} : vector<2x3xf32> to vector<2x1xf32>
    %421 = vector.extract_strided_slice %1 {offsets = [1, 0], sizes = [1, 12], strides = [1, 1]} : vector<3x12xf32> to vector<1x12xf32>
    %422 = vector.broadcast %420 : vector<2x1xf32> to vector<2x12xf32>
    %423 = vector.broadcast %421 : vector<1x12xf32> to vector<2x12xf32>
    %424 = arith.mulf %422, %423 : vector<2x12xf32>
    %425 = arith.addf %419, %424 : vector<2x12xf32>
    %426 = vector.extract_strided_slice %391 {offsets = [0, 2], sizes = [2, 1], strides = [1, 1]} : vector<2x3xf32> to vector<2x1xf32>
    %427 = vector.extract_strided_slice %1 {offsets = [2, 0], sizes = [1, 12], strides = [1, 1]} : vector<3x12xf32> to vector<1x12xf32>
    %428 = vector.broadcast %426 : vector<2x1xf32> to vector<2x12xf32>
    %429 = vector.broadcast %427 : vector<1x12xf32> to vector<2x12xf32>
    %430 = arith.mulf %428, %429 : vector<2x12xf32>
    %431 = arith.addf %425, %430 : vector<2x12xf32>
    %432 = arith.negf %431 : vector<2x12xf32>
    %433 = math.exp %432 : vector<2x12xf32>
    %cst_34 = arith.constant 1.000000e+00 : f32
    %434 = vector.broadcast %cst_34 : f32 to vector<2x12xf32>
    %435 = arith.addf %434, %433 : vector<2x12xf32>
    %436 = arith.divf %434, %435 : vector<2x12xf32>
    %437 = math.tanh %431 : vector<2x12xf32>
    %438 = vector.extract_strided_slice %436 {offsets = [0, 0], sizes = [2, 3], strides = [1, 1]} : vector<2x12xf32> to vector<2x3xf32>
    %439 = vector.extract_strided_slice %436 {offsets = [0, 3], sizes = [2, 3], strides = [1, 1]} : vector<2x12xf32> to vector<2x3xf32>
    %440 = vector.extract_strided_slice %437 {offsets = [0, 6], sizes = [2, 3], strides = [1, 1]} : vector<2x12xf32> to vector<2x3xf32>
    %441 = vector.extract_strided_slice %436 {offsets = [0, 9], sizes = [2, 3], strides = [1, 1]} : vector<2x12xf32> to vector<2x3xf32>
    %442 = arith.mulf %439, %389 : vector<2x3xf32>
    %443 = arith.mulf %438, %440 : vector<2x3xf32>
    %444 = arith.addf %442, %443 : vector<2x3xf32>
    %445 = math.tanh %444 : vector<2x3xf32>
    %446 = arith.mulf %441, %445 : vector<2x3xf32>
    %447 = vector.shape_cast %4 : vector<1x3xf32> to vector<1x3xf32>
    %448 = vector.broadcast %447 : vector<1x3xf32> to vector<2x3xf32>
    %449 = vector.extract_strided_slice %446 {offsets = [0, 0], sizes = [2, 1], strides = [1, 1]} : vector<2x3xf32> to vector<2x1xf32>
    %450 = vector.extract_strided_slice %3 {offsets = [0, 0], sizes = [1, 3], strides = [1, 1]} : vector<3x3xf32> to vector<1x3xf32>
    %451 = vector.broadcast %449 : vector<2x1xf32> to vector<2x3xf32>
    %452 = vector.broadcast %450 : vector<1x3xf32> to vector<2x3xf32>
    %453 = arith.mulf %451, %452 : vector<2x3xf32>
    %454 = arith.addf %448, %453 : vector<2x3xf32>
    %455 = vector.extract_strided_slice %446 {offsets = [0, 1], sizes = [2, 1], strides = [1, 1]} : vector<2x3xf32> to vector<2x1xf32>
    %456 = vector.extract_strided_slice %3 {offsets = [1, 0], sizes = [1, 3], strides = [1, 1]} : vector<3x3xf32> to vector<1x3xf32>
    %457 = vector.broadcast %455 : vector<2x1xf32> to vector<2x3xf32>
    %458 = vector.broadcast %456 : vector<1x3xf32> to vector<2x3xf32>
    %459 = arith.mulf %457, %458 : vector<2x3xf32>
    %460 = arith.addf %454, %459 : vector<2x3xf32>
    %461 = vector.extract_strided_slice %446 {offsets = [0, 2], sizes = [2, 1], strides = [1, 1]} : vector<2x3xf32> to vector<2x1xf32>
    %462 = vector.extract_strided_slice %3 {offsets = [2, 0], sizes = [1, 3], strides = [1, 1]} : vector<3x3xf32> to vector<1x3xf32>
    %463 = vector.broadcast %461 : vector<2x1xf32> to vector<2x3xf32>
    %464 = vector.broadcast %462 : vector<1x3xf32> to vector<2x3xf32>
    %465 = arith.mulf %463, %464 : vector<2x3xf32>
    %466 = arith.addf %460, %465 : vector<2x3xf32>
    %c0_35 = arith.constant 0 : index
    %c0_36 = arith.constant 0 : index
    %467 = vector.load %arg6[%c0_35, %c0_36] : memref<2x3xf32, #tpu.memory_space<vmem>>, vector<2x3xf32>
    tpu.vector_store %arg6[%c0_35, %c0_36], %466 {strides = array<i32>} : memref<2x3xf32, #tpu.memory_space<vmem>>, vector<2x3xf32>,
    return
  }
}

</mosaic_0001>

<bundles_post_ra>
// kernel: tpu_custom_call.1
= control target key start
LH: loop header
LB: loop body
LE: loop exit
PB: predicated region body
PF: predicated region fallthrough
CT: control target
= control target key end

     0   :  { %v773_v1 = vmov 0   ;;  %v774_v2 = vmov 2   ;;  %s1026_s0 = inlined_call_operand.vmem [shape: f32[8,2,3], index: 0, kind: input, shape index: {}]   ;;  %s1027_s1 = inlined_call_operand.vmem [shape: f32[3,12], index: 1, kind: input, shape index: {}]   ;;  %s1028_s2 = inlined_call_operand.vmem [shape: f32[3,12], index: 2, kind: input, shape index: {}]   ;;  %s1029_s3 = inlined_call_operand.vmem [shape: f32[1,12], index: 3, kind: input, shape index: {}]   ;;  %s1030_s4 = inlined_call_operand.vmem [shape: f32[3,3], index: 4, kind: input, shape index: {}]   ;;  %s1031_s5 = inlined_call_operand.vmem [shape: f32[1,3], index: 5, kind: input, shape index: {}]   ;;  %s1032_s6 = inlined_call_operand.hbm [shape: f32[2,3], index: 6, kind: output, shape index: {}]  }
   0x1   :  { %v29_v0 = vld [vmem:[%s1026_s0] sm:$0x3]  ;;  %637 = vset.pattern.permute.xlu0 %v773_v1  ;;  %639 = vset.pattern.permute.xlu1 %v774_v2 }
   0x2   :  { %11 = vsyncpa [#allocation3], 0  ;;  %38 = vperm.xlu0 %637, %v29_v0   ;;  %58 = vperm.xlu1 %639, %v29_v0   ;;  %v775_v3 = vmov 1   ;;  %v41_v4 = vlaneseq  ;;  %v24_v7 = vld [vmem:[%s1027_s1] sm:$0x7]  ;;  %v778_v44 = vmov 10  }
   0x3   :  { %v25_v12 = vld [vmem:[%s1028_s2] sm:$0x7]  ;;  %s776_s2 = smov 122   ;;  %s779_s30 = smov 6   ;;  %v780_v46 = vmov 9   ;;  %v781_v49 = vmov 11  }
   0x4   :  { %v42_v5 = vshrl.u32 %v41_v4, 7  ;;  %v850_v16 = vld [vmem:[%s1029_s3] ss:$0 sm:$0xff]  ;;  %s777_s3 = smov 3   ;;  %v612_v40 = vld [vmem:[%s1026_s0 + $0x2] sm:$0x3] }
   0x5   :  { %s782_s22 = smov [#allocation2]   ;;  %vm594_vm0 = vcmask 17408  }
   0x6   :  { %638 = vset.pattern.permute.xlu0 %v775_v3  ;;  %640 = vset.pattern.permute.xlu1 %v773_v1  ;;  %v825_v6 = vsub.s32 0, %v42_v5  ;;  %v833_v9 = vsub.s32 1, %v42_v5  ;;  %v835_v10 = vsub.s32 2, %v42_v5  ;;  %s602_s23 = sshll.u32 %s782_s22, 4  ;;  %s603_s23 = int_to_ptr.vmem [resolvable:$true] %s602_s23 }
   0x7   :  { %48 = vperm.xlu0 %638, %v29_v0   ;;  %p754_p1 = scmp.lt.s32.totalorder %s603_s23, %s603_s23 }
   0x8   :  { %v831_v8 = vrot.slane %v24_v7, %v825_v6  ;;  %v842_v14 = vrot.slane %v24_v7, %v833_v9  ;;  %v845_v15 = vrot.slane %v24_v7, %v835_v10  ;;  %v853_v18 = vrot.slane %v25_v12, %v825_v6 }
   0x9   :  { %v859_v23 = vrot.slane %v25_v12, %v833_v9  ;;  %v863_v26 = vrot.slane %v25_v12, %v835_v10 }
   0xa   :  { %v71_v25 = vmul.f32 0.0, %v853_v18 }
   0xb   :  { %v77_v28 = vmul.f32 0.0, %v859_v23  ;;  %v83_v30 = vmul.f32 0.0, %v863_v26 }
  0x81   :  { %v39_v11 = vpop.permute.xlu0 %38  ;;  %v59_v17 = vpop.permute.xlu1 %58 }
  0x82   :  { %v45_v13 = vmul.f32 %v831_v8, %v39_v11  ;;  %v65_v22 = vmul.f32 %v845_v15, %v59_v17 }
  0x84   :  { %v46_v20 = vadd.f32 %v850_v16, %v45_v13 }
  0x86   :  { %v49_v19 = vpop.permute.xlu0 %48 }
  0x87   :  { %v55_v21 = vmul.f32 %v842_v14, %v49_v19 }
  0x89   :  { %v56_v24 = vadd.f32 %v55_v21, %v46_v20 }
  0x8b   :  { %v66_v27 = vadd.f32 %v65_v22, %v56_v24  ;;  %v614_v22 = vld [vmem:[%s1026_s0 + $0x4] sm:$0x3] }
  0x8d   :  { %v72_v29 = vadd.f32 %v71_v25, %v66_v27 }
  0x8f   :  { %v78_v31 = vadd.f32 %v77_v28, %v72_v29 }
  0x91   :  { %v84_v32 = vadd.f32 %v83_v30, %v78_v31 }
  0x93   :  { %685 = vtanh.f32 %v84_v32  ;;  %v611_v34 = vmul.f32 -1.442695, %v84_v32 }
  0x95   :  { %687 = vpow2.f32 %v611_v34 }
  0x9d   :  { %v686_v33 = vpop.eup %685 }
  0x9e   :  { %94 = vrot.lane.b32.xlu1 %v686_v33, %s776_s2 }
  0x9f   :  { %v688_v35 = vpop.eup %687 }
  0xa0   :  { %v88_v36 = vadd.f32 1.0, %v688_v35 }
  0xa2   :  { %689 = vrcp.f32 %v88_v36 }
  0xac   :  { %v690_v37 = vpop.eup %689 }
  0xad   :  { %v92_v41 = vmul.f32 0.0, %v690_v37 }
 0x110   :  { %v95_v38 = vpop.permute.xlu1 %94 }
 0x111   :  { %v97_v39 = vmul.f32 %v690_v37, %v95_v38 }
 0x113   :  { %99 = vrot.lane.b32.xlu1 %v97_v39, %s777_s3 }
 0x117   :  { %113 = vperm.xlu1 %640, %v612_v40  }
 0x11b   :  { %641 = vset.pattern.permute.xlu1 %v774_v2 }
 0x11c   :  { %125 = vperm.xlu1 %641, %v612_v40  }
 0x120   :  { %643 = vset.pattern.permute.xlu1 %v778_v44 }
 0x185   :  { %v100_v42 = vpop.permute.xlu1 %99 }
 0x186   :  { %v102_v43 = vadd.f32 %v100_v42, %v92_v41 }
 0x188   :  { %691 = vtanh.f32 %v102_v43 }
 0x192   :  { %v692_v45 = vpop.eup %691 }
 0x193   :  { %105 = vrot.lane.b32.xlu0 %v692_v45, %s779_s30 }
 0x196   :  { %v114_v50 = vpop.permute.xlu1 %113 }
 0x197   :  { %119 = vperm.xlu0 %638, %v612_v40   ;;  %v116_v51 = vmul.f32 %v114_v50, %v831_v8 }
 0x199   :  { %v117_v53 = vadd.f32 %v850_v16, %v116_v51 }
 0x19b   :  { %642 = vset.pattern.permute.xlu0 %v780_v46  ;;  %v126_v55 = vpop.permute.xlu1 %125 }
 0x19c   :  { %v128_v57 = vmul.f32 %v126_v55, %v845_v15 }
 0x205   :  { %v106_v47 = vpop.permute.xlu0 %105 }
 0x206   :  { %v108_v48 = vmul.f32 %v690_v37, %v106_v47 }
 0x208   :  { %138 = vperm.xlu1 %643, %v108_v48   ;;  %132 = vperm.xlu0 %642, %v108_v48  }
 0x20c   :  { %644 = vset.pattern.permute.xlu1 %v781_v49  ;;  %646 = vset.pattern.permute.xlu0 %v775_v3 }
 0x20d   :  { %144 = vperm.xlu1 %644, %v108_v48  }
 0x211   :  { %645 = vset.pattern.permute.xlu1 %v773_v1 }
 0x216   :  { %v120_v52 = vpop.permute.xlu0 %119 }
 0x217   :  { %v122_v54 = vmul.f32 %v120_v52, %v842_v14 }
 0x219   :  { %v123_v56 = vadd.f32 %v122_v54, %v117_v53 }
 0x21b   :  { %v129_v60 = vadd.f32 %v128_v57, %v123_v56 }
 0x287   :  { %v139_v58 = vpop.permute.xlu1 %138  ;;  %v133_v59 = vpop.permute.xlu0 %132 }
 0x288   :  { %v135_v61 = vmul.f32 %v133_v59, %v853_v18  ;;  %v141_v62 = vmul.f32 %v139_v58, %v859_v23  ;;  %v616_v59 = vld [vmem:[%s1026_s0 + $0x6] sm:$0x3] }
 0x28a   :  { %v136_v63 = vadd.f32 %v135_v61, %v129_v60 }
 0x28c   :  { %v145_v0 = vpop.permute.xlu1 %144  ;;  %v142_v4 = vadd.f32 %v141_v62, %v136_v63 }
 0x28d   :  { %v147_v5 = vmul.f32 %v145_v0, %v863_v26 }
 0x28f   :  { %v148_v7 = vadd.f32 %v147_v5, %v142_v4 }
 0x291   :  { %693 = vtanh.f32 %v148_v7  ;;  %v613_v12 = vmul.f32 -1.442695, %v148_v7 }
 0x293   :  { %695 = vpow2.f32 %v613_v12 }
 0x29b   :  { %v694_v11 = vpop.eup %693 }
 0x29c   :  { %158 = vrot.lane.b32.xlu0 %v694_v11, %s776_s2 }
 0x29d   :  { %v696_v13 = vpop.eup %695 }
 0x29e   :  { %v152_v17 = vadd.f32 1.0, %v696_v13 }
 0x2a0   :  { %697 = vrcp.f32 %v152_v17 }
 0x2aa   :  { %v698_v19 = vpop.eup %697 }
 0x2ab   :  { %v156_v24 = vmul.f32 %v698_v19, %v102_v43 }
 0x30e   :  { %v159_v20 = vpop.permute.xlu0 %158 }
 0x30f   :  { %v161_v21 = vmul.f32 %v698_v19, %v159_v20 }
 0x311   :  { %163 = vrot.lane.b32.xlu1 %v161_v21, %s777_s3 }
 0x315   :  { %177 = vperm.xlu1 %645, %v614_v22  }
 0x319   :  { %647 = vset.pattern.permute.xlu1 %v774_v2 }
 0x31a   :  { %189 = vperm.xlu1 %647, %v614_v22  }
 0x31e   :  { %648 = vset.pattern.permute.xlu1 %v780_v46 }
 0x383   :  { %v164_v25 = vpop.permute.xlu1 %163 }
 0x384   :  { %v166_v27 = vadd.f32 %v164_v25, %v156_v24 }
 0x386   :  { %699 = vtanh.f32 %v166_v27 }
 0x390   :  { %v700_v28 = vpop.eup %699 }
 0x391   :  { %169 = vrot.lane.b32.xlu0 %v700_v28, %s779_s30 }
 0x394   :  { %v178_v31 = vpop.permute.xlu1 %177 }
 0x395   :  { %183 = vperm.xlu0 %646, %v614_v22   ;;  %v180_v32 = vmul.f32 %v178_v31, %v831_v8 }
 0x397   :  { %v181_v34 = vadd.f32 %v850_v16, %v180_v32 }
 0x399   :  { %649 = vset.pattern.permute.xlu0 %v778_v44  ;;  %v190_v36 = vpop.permute.xlu1 %189 }
 0x39a   :  { %v192_v38 = vmul.f32 %v190_v36, %v845_v15 }
 0x403   :  { %v170_v29 = vpop.permute.xlu0 %169 }
 0x404   :  { %v172_v30 = vmul.f32 %v698_v19, %v170_v29 }
 0x406   :  { %202 = vperm.xlu0 %649, %v172_v30   ;;  %196 = vperm.xlu1 %648, %v172_v30  }
 0x40a   :  { %650 = vset.pattern.permute.xlu1 %v781_v49  ;;  %651 = vset.pattern.permute.xlu0 %v773_v1 }
 0x40b   :  { %208 = vperm.xlu1 %650, %v172_v30  }
 0x40f   :  { %652 = vset.pattern.permute.xlu1 %v775_v3 }
 0x414   :  { %v184_v33 = vpop.permute.xlu0 %183 }
 0x415   :  { %v186_v35 = vmul.f32 %v184_v33, %v842_v14 }
 0x417   :  { %v187_v37 = vadd.f32 %v186_v35, %v181_v34 }
 0x419   :  { %v193_v41 = vadd.f32 %v192_v38, %v187_v37 }
 0x485   :  { %v197_v39 = vpop.permute.xlu1 %196  ;;  %v203_v40 = vpop.permute.xlu0 %202 }
 0x486   :  { %v199_v42 = vmul.f32 %v197_v39, %v853_v18  ;;  %v205_v45 = vmul.f32 %v203_v40, %v859_v23  ;;  %v618_v40 = vld [vmem:[%s1026_s0 + $0x8] sm:$0x3] }
 0x488   :  { %v200_v43 = vadd.f32 %v199_v42, %v193_v41 }
 0x48a   :  { %v206_v47 = vadd.f32 %v205_v45, %v200_v43  ;;  %v209_v48 = vpop.permute.xlu1 %208 }
 0x48b   :  { %v211_v50 = vmul.f32 %v209_v48, %v863_v26 }
 0x48d   :  { %v212_v51 = vadd.f32 %v211_v50, %v206_v47 }
 0x48f   :  { %701 = vtanh.f32 %v212_v51  ;;  %v615_v53 = vmul.f32 -1.442695, %v212_v51 }
 0x491   :  { %703 = vpow2.f32 %v615_v53 }
 0x499   :  { %v702_v52 = vpop.eup %701 }
 0x49a   :  { %222 = vrot.lane.b32.xlu1 %v702_v52, %s776_s2 }
 0x49b   :  { %v704_v54 = vpop.eup %703 }
 0x49c   :  { %v216_v55 = vadd.f32 1.0, %v704_v54 }
 0x49e   :  { %705 = vrcp.f32 %v216_v55 }
 0x4a8   :  { %v706_v56 = vpop.eup %705 }
 0x4a9   :  { %v220_v60 = vmul.f32 %v706_v56, %v166_v27 }
 0x50c   :  { %v223_v57 = vpop.permute.xlu1 %222 }
 0x50d   :  { %v225_v58 = vmul.f32 %v706_v56, %v223_v57 }
 0x50f   :  { %227 = vrot.lane.b32.xlu0 %v225_v58, %s777_s3 }
 0x513   :  { %241 = vperm.xlu0 %651, %v616_v59  }
 0x517   :  { %654 = vset.pattern.permute.xlu0 %v780_v46 }
 0x581   :  { %v228_v61 = vpop.permute.xlu0 %227 }
 0x582   :  { %v230_v62 = vadd.f32 %v228_v61, %v220_v60 }
 0x584   :  { %707 = vtanh.f32 %v230_v62 }
 0x58e   :  { %v708_v63 = vpop.eup %707 }
 0x58f   :  { %233 = vrot.lane.b32.xlu1 %v708_v63, %s779_s30 }
 0x592   :  { %v242_v5 = vpop.permute.xlu0 %241 }
 0x593   :  { %247 = vperm.xlu1 %652, %v616_v59   ;;  %v244_v11 = vmul.f32 %v242_v5, %v831_v8 }
 0x595   :  { %v245_v12 = vadd.f32 %v850_v16, %v244_v11 }
 0x597   :  { %653 = vset.pattern.permute.xlu1 %v774_v2 }
 0x598   :  { %253 = vperm.xlu1 %653, %v616_v59  }
 0x59c   :  { %655 = vset.pattern.permute.xlu1 %v778_v44 }
 0x601   :  { %v234_v0 = vpop.permute.xlu1 %233 }
 0x602   :  { %v236_v4 = vmul.f32 %v706_v56, %v234_v0 }
 0x604   :  { %266 = vperm.xlu1 %655, %v236_v4   ;;  %260 = vperm.xlu0 %654, %v236_v4  }
 0x608   :  { %656 = vset.pattern.permute.xlu1 %v781_v49  ;;  %658 = vset.pattern.permute.xlu0 %v775_v3 }
 0x609   :  { %272 = vperm.xlu1 %656, %v236_v4  }
 0x60d   :  { %657 = vset.pattern.permute.xlu1 %v773_v1 }
 0x612   :  { %v248_v7 = vpop.permute.xlu1 %247 }
 0x613   :  { %v250_v13 = vmul.f32 %v248_v7, %v842_v14 }
 0x615   :  { %v251_v19 = vadd.f32 %v250_v13, %v245_v12 }
 0x617   :  { %v254_v17 = vpop.permute.xlu1 %253 }
 0x618   :  { %v256_v20 = vmul.f32 %v254_v17, %v845_v15 }
 0x61a   :  { %v257_v24 = vadd.f32 %v256_v20, %v251_v19 }
 0x683   :  { %v261_v21 = vpop.permute.xlu0 %260  ;;  %v267_v22 = vpop.permute.xlu1 %266 }
 0x684   :  { %v263_v25 = vmul.f32 %v261_v21, %v853_v18  ;;  %v269_v28 = vmul.f32 %v267_v22, %v859_v23  ;;  %v620_v22 = vld [vmem:[%s1026_s0 + $0xa] sm:$0x3] }
 0x686   :  { %v264_v27 = vadd.f32 %v263_v25, %v257_v24 }
 0x688   :  { %v270_v29 = vadd.f32 %v269_v28, %v264_v27  ;;  %v273_v30 = vpop.permute.xlu1 %272 }
 0x689   :  { %v275_v31 = vmul.f32 %v273_v30, %v863_v26 }
 0x68b   :  { %v276_v32 = vadd.f32 %v275_v31, %v270_v29 }
 0x68d   :  { %709 = vtanh.f32 %v276_v32  ;;  %v617_v34 = vmul.f32 -1.442695, %v276_v32 }
 0x68f   :  { %711 = vpow2.f32 %v617_v34 }
 0x697   :  { %v710_v33 = vpop.eup %709 }
 0x698   :  { %286 = vrot.lane.b32.xlu0 %v710_v33, %s776_s2 }
 0x699   :  { %v712_v35 = vpop.eup %711 }
 0x69a   :  { %v280_v36 = vadd.f32 1.0, %v712_v35 }
 0x69c   :  { %713 = vrcp.f32 %v280_v36 }
 0x6a6   :  { %v714_v37 = vpop.eup %713 }
 0x6a7   :  { %v284_v41 = vmul.f32 %v714_v37, %v230_v62 }
 0x70a   :  { %v287_v38 = vpop.permute.xlu0 %286 }
 0x70b   :  { %v289_v39 = vmul.f32 %v714_v37, %v287_v38 }
 0x70d   :  { %291 = vrot.lane.b32.xlu1 %v289_v39, %s777_s3 }
 0x711   :  { %305 = vperm.xlu1 %657, %v618_v40  }
 0x715   :  { %659 = vset.pattern.permute.xlu1 %v774_v2 }
 0x716   :  { %317 = vperm.xlu1 %659, %v618_v40  }
 0x71a   :  { %660 = vset.pattern.permute.xlu1 %v780_v46 }
 0x77f   :  { %v292_v42 = vpop.permute.xlu1 %291 }
 0x780   :  { %v294_v43 = vadd.f32 %v292_v42, %v284_v41 }
 0x782   :  { %715 = vtanh.f32 %v294_v43 }
 0x78c   :  { %v716_v45 = vpop.eup %715 }
 0x78d   :  { %297 = vrot.lane.b32.xlu0 %v716_v45, %s779_s30 }
 0x790   :  { %v306_v50 = vpop.permute.xlu1 %305 }
 0x791   :  { %311 = vperm.xlu0 %658, %v618_v40   ;;  %v308_v51 = vmul.f32 %v306_v50, %v831_v8 }
 0x793   :  { %v309_v53 = vadd.f32 %v850_v16, %v308_v51 }
 0x795   :  { %661 = vset.pattern.permute.xlu0 %v778_v44  ;;  %v318_v55 = vpop.permute.xlu1 %317 }
 0x796   :  { %v320_v57 = vmul.f32 %v318_v55, %v845_v15 }
 0x7ff   :  { %v298_v47 = vpop.permute.xlu0 %297 }
 0x800   :  { %v300_v48 = vmul.f32 %v714_v37, %v298_v47 }
 0x802   :  { %330 = vperm.xlu0 %661, %v300_v48   ;;  %324 = vperm.xlu1 %660, %v300_v48  }
 0x806   :  { %662 = vset.pattern.permute.xlu1 %v781_v49  ;;  %663 = vset.pattern.permute.xlu0 %v773_v1 }
 0x807   :  { %336 = vperm.xlu1 %662, %v300_v48  }
 0x80b   :  { %664 = vset.pattern.permute.xlu1 %v775_v3 }
 0x810   :  { %v312_v52 = vpop.permute.xlu0 %311 }
 0x811   :  { %v314_v54 = vmul.f32 %v312_v52, %v842_v14 }
 0x813   :  { %v315_v56 = vadd.f32 %v314_v54, %v309_v53 }
 0x815   :  { %v321_v60 = vadd.f32 %v320_v57, %v315_v56 }
 0x881   :  { %v325_v58 = vpop.permute.xlu1 %324  ;;  %v331_v59 = vpop.permute.xlu0 %330 }
 0x882   :  { %v327_v61 = vmul.f32 %v325_v58, %v853_v18  ;;  %v333_v63 = vmul.f32 %v331_v59, %v859_v23  ;;  %v622_v59 = vld [vmem:[%s1026_s0 + $0xc] sm:$0x3] }
 0x884   :  { %v328_v62 = vadd.f32 %v327_v61, %v321_v60 }
 0x886   :  { %v334_v0 = vadd.f32 %v333_v63, %v328_v62  ;;  %v337_v4 = vpop.permute.xlu1 %336 }
 0x887   :  { %v339_v5 = vmul.f32 %v337_v4, %v863_v26 }
 0x889   :  { %v340_v7 = vadd.f32 %v339_v5, %v334_v0 }
 0x88b   :  { %717 = vtanh.f32 %v340_v7  ;;  %v619_v12 = vmul.f32 -1.442695, %v340_v7 }
 0x88d   :  { %719 = vpow2.f32 %v619_v12 }
 0x895   :  { %v718_v11 = vpop.eup %717 }
 0x896   :  { %350 = vrot.lane.b32.xlu1 %v718_v11, %s776_s2 }
 0x897   :  { %v720_v13 = vpop.eup %719 }
 0x898   :  { %v344_v17 = vadd.f32 1.0, %v720_v13 }
 0x89a   :  { %721 = vrcp.f32 %v344_v17 }
 0x8a4   :  { %v722_v19 = vpop.eup %721 }
 0x8a5   :  { %v348_v24 = vmul.f32 %v722_v19, %v294_v43 }
 0x908   :  { %v351_v20 = vpop.permute.xlu1 %350 }
 0x909   :  { %v353_v21 = vmul.f32 %v722_v19, %v351_v20 }
 0x90b   :  { %355 = vrot.lane.b32.xlu0 %v353_v21, %s777_s3 }
 0x90f   :  { %369 = vperm.xlu0 %663, %v620_v22  }
 0x913   :  { %666 = vset.pattern.permute.xlu0 %v780_v46 }
 0x97d   :  { %v356_v25 = vpop.permute.xlu0 %355 }
 0x97e   :  { %v358_v27 = vadd.f32 %v356_v25, %v348_v24 }
 0x980   :  { %723 = vtanh.f32 %v358_v27 }
 0x98a   :  { %v724_v28 = vpop.eup %723 }
 0x98b   :  { %361 = vrot.lane.b32.xlu1 %v724_v28, %s779_s30 }
 0x98e   :  { %v370_v31 = vpop.permute.xlu0 %369 }
 0x98f   :  { %375 = vperm.xlu1 %664, %v620_v22   ;;  %v372_v33 = vmul.f32 %v370_v31, %v831_v8 }
 0x991   :  { %v373_v34 = vadd.f32 %v850_v16, %v372_v33 }
 0x993   :  { %665 = vset.pattern.permute.xlu1 %v774_v2 }
 0x994   :  { %381 = vperm.xlu1 %665, %v620_v22  }
 0x998   :  { %667 = vset.pattern.permute.xlu1 %v778_v44 }
 0x9fd   :  { %v362_v29 = vpop.permute.xlu1 %361 }
 0x9fe   :  { %v364_v30 = vmul.f32 %v722_v19, %v362_v29 }
 0xa00   :  { %394 = vperm.xlu1 %667, %v364_v30   ;;  %388 = vperm.xlu0 %666, %v364_v30  }
 0xa04   :  { %668 = vset.pattern.permute.xlu1 %v781_v49  ;;  %670 = vset.pattern.permute.xlu0 %v775_v3 }
 0xa05   :  { %400 = vperm.xlu1 %668, %v364_v30  }
 0xa09   :  { %669 = vset.pattern.permute.xlu1 %v773_v1 }
 0xa0e   :  { %v376_v32 = vpop.permute.xlu1 %375 }
 0xa0f   :  { %v378_v35 = vmul.f32 %v376_v32, %v842_v14 }
 0xa11   :  { %v379_v37 = vadd.f32 %v378_v35, %v373_v34 }
 0xa13   :  { %v382_v36 = vpop.permute.xlu1 %381 }
 0xa14   :  { %v384_v38 = vmul.f32 %v382_v36, %v845_v15 }
 0xa16   :  { %v385_v41 = vadd.f32 %v384_v38, %v379_v37  ;;  %v624_v38 = vld [vmem:[%s1026_s0 + $0xe] sm:$0x3] }
 0xa7f   :  { %v389_v39 = vpop.permute.xlu0 %388  ;;  %v395_v40 = vpop.permute.xlu1 %394 }
 0xa80   :  { %v391_v42 = vmul.f32 %v389_v39, %v853_v18  ;;  %v397_v45 = vmul.f32 %v395_v40, %v859_v23 }
 0xa82   :  { %v392_v43 = vadd.f32 %v391_v42, %v385_v41 }
 0xa84   :  { %v398_v47 = vadd.f32 %v397_v45, %v392_v43  ;;  %v401_v48 = vpop.permute.xlu1 %400 }
 0xa85   :  { %v403_v50 = vmul.f32 %v401_v48, %v863_v26 }
 0xa87   :  { %v404_v51 = vadd.f32 %v403_v50, %v398_v47 }
 0xa89   :  { %725 = vtanh.f32 %v404_v51  ;;  %v621_v53 = vmul.f32 -1.442695, %v404_v51 }
 0xa8b   :  { %727 = vpow2.f32 %v621_v53 }
 0xa93   :  { %v726_v52 = vpop.eup %725 }
 0xa94   :  { %414 = vrot.lane.b32.xlu0 %v726_v52, %s776_s2 }
 0xa95   :  { %v728_v54 = vpop.eup %727 }
 0xa96   :  { %v408_v55 = vadd.f32 1.0, %v728_v54 }
 0xa98   :  { %729 = vrcp.f32 %v408_v55 }
 0xaa2   :  { %v730_v56 = vpop.eup %729 }
 0xaa3   :  { %v412_v60 = vmul.f32 %v730_v56, %v358_v27 }
 0xb06   :  { %v415_v57 = vpop.permute.xlu0 %414 }
 0xb07   :  { %v417_v58 = vmul.f32 %v730_v56, %v415_v57 }
 0xb09   :  { %419 = vrot.lane.b32.xlu1 %v417_v58, %s777_s3 }
 0xb0d   :  { %433 = vperm.xlu1 %669, %v622_v59  }
 0xb11   :  { %671 = vset.pattern.permute.xlu1 %v774_v2 }
 0xb12   :  { %445 = vperm.xlu1 %671, %v622_v59  }
 0xb16   :  { %672 = vset.pattern.permute.xlu1 %v780_v46 }
 0xb7b   :  { %v420_v61 = vpop.permute.xlu1 %419 }
 0xb7c   :  { %v422_v62 = vadd.f32 %v420_v61, %v412_v60 }
 0xb7e   :  { %731 = vtanh.f32 %v422_v62 }
 0xb88   :  { %v732_v63 = vpop.eup %731 }
 0xb89   :  { %425 = vrot.lane.b32.xlu0 %v732_v63, %s779_s30 }
 0xb8c   :  { %v434_v5 = vpop.permute.xlu1 %433 }
 0xb8d   :  { %439 = vperm.xlu0 %670, %v622_v59   ;;  %v436_v7 = vmul.f32 %v434_v5, %v831_v8 }
 0xb8f   :  { %v437_v12 = vadd.f32 %v850_v16, %v436_v7 }
 0xb91   :  { %673 = vset.pattern.permute.xlu0 %v778_v44  ;;  %v446_v17 = vpop.permute.xlu1 %445 }
 0xb92   :  { %v448_v20 = vmul.f32 %v446_v17, %v845_v15 }
 0xbfb   :  { %v426_v0 = vpop.permute.xlu0 %425 }
 0xbfc   :  { %v428_v4 = vmul.f32 %v730_v56, %v426_v0 }
 0xbfe   :  { %458 = vperm.xlu0 %673, %v428_v4   ;;  %452 = vperm.xlu1 %672, %v428_v4  }
 0xc02   :  { %674 = vset.pattern.permute.xlu1 %v781_v49  ;;  %675 = vset.pattern.permute.xlu0 %v773_v1 }
 0xc03   :  { %464 = vperm.xlu1 %674, %v428_v4  }
 0xc07   :  { %676 = vset.pattern.permute.xlu1 %v775_v3 }
 0xc0c   :  { %v440_v11 = vpop.permute.xlu0 %439 }
 0xc0d   :  { %v442_v13 = vmul.f32 %v440_v11, %v842_v14 }
 0xc0f   :  { %v443_v19 = vadd.f32 %v442_v13, %v437_v12  ;;  %v27_v12 = vld [vmem:[%s1030_s4] sm:$0x7]  ;;  %s749_s4 = scalar_lea.vmem %s603_s23, 32 }
 0xc10   :  { %v571_v13 = vrot.slane %v27_v12, %v825_v6  ;;  %v581_v17 = vrot.slane %v27_v12, %v833_v9  ;;  %p750_p0 = scmp.ne.s32.totalorder %s603_s23, %s749_s4  ;;  %p755_p2 = scmp.lt.s32.totalorder %s749_s4, %s749_s4 }
 0xc11   :  { %v449_v24 = vadd.f32 %v448_v20, %v443_v19  ;;  %v626_v20 = vld [vmem:[%s1031_s5] ss:$0 sm:$0xff] }
 0xc12   :  { %p756_p3 = por %p755_p2, %p754_p1 }
 0xc14   :  { %p757_p4 = pnand %p756_p3, %p750_p0 }
 0xc7d   :  { %v453_v21 = vpop.permute.xlu1 %452  ;;  %v459_v22 = vpop.permute.xlu0 %458 }
 0xc7e   :  { %v455_v1 = vmul.f32 %v453_v21, %v853_v18  ;;  %v461_v3 = vmul.f32 %v459_v22, %v859_v23 }
 0xc80   :  { %v456_v25 = vadd.f32 %v455_v1, %v449_v24  ;;  %v591_v24 = vrot.slane %v27_v12, %v835_v10 }
 0xc82   :  { %v462_v27 = vadd.f32 %v461_v3, %v456_v25  ;;  %v465_v28 = vpop.permute.xlu1 %464 }
 0xc83   :  { %v467_v29 = vmul.f32 %v465_v28, %v863_v26 }
 0xc85   :  { %v468_v30 = vadd.f32 %v467_v29, %v462_v27 }
 0xc87   :  { %733 = vtanh.f32 %v468_v30  ;;  %v623_v32 = vmul.f32 -1.442695, %v468_v30 }
 0xc89   :  { %735 = vpow2.f32 %v623_v32 }
 0xc91   :  { %v734_v31 = vpop.eup %733 }
 0xc92   :  { %478 = vrot.lane.b32.xlu1 %v734_v31, %s776_s2 }
 0xc93   :  { %v736_v33 = vpop.eup %735 }
 0xc94   :  { %v472_v34 = vadd.f32 1.0, %v736_v33 }
 0xc96   :  { %737 = vrcp.f32 %v472_v34 }
 0xca0   :  { %v738_v35 = vpop.eup %737 }
 0xca1   :  { %v476_v39 = vmul.f32 %v738_v35, %v422_v62 }
 0xd04   :  { %v479_v36 = vpop.permute.xlu1 %478 }
 0xd05   :  { %v481_v37 = vmul.f32 %v738_v35, %v479_v36 }
 0xd07   :  { %483 = vrot.lane.b32.xlu0 %v481_v37, %s777_s3 }
 0xd0b   :  { %497 = vperm.xlu0 %675, %v624_v38  }
 0xd0f   :  { %678 = vset.pattern.permute.xlu0 %v780_v46 }
 0xd79   :  { %v484_v40 = vpop.permute.xlu0 %483 }
 0xd7a   :  { %v486_v41 = vadd.f32 %v484_v40, %v476_v39 }
 0xd7c   :  { %739 = vtanh.f32 %v486_v41 }
 0xd86   :  { %v740_v42 = vpop.eup %739 }
 0xd87   :  { %489 = vrot.lane.b32.xlu1 %v740_v42, %s779_s30 }
 0xd8a   :  { %v498_v47 = vpop.permute.xlu0 %497 }
 0xd8b   :  { %503 = vperm.xlu1 %676, %v624_v38   ;;  %v500_v50 = vmul.f32 %v498_v47, %v831_v8 }
 0xd8f   :  { %677 = vset.pattern.permute.xlu1 %v774_v2  ;;  %v501_v2 = vadd.f32 %v850_v16, %v500_v50 }
 0xd90   :  { %509 = vperm.xlu1 %677, %v624_v38  }
 0xd94   :  { %679 = vset.pattern.permute.xlu1 %v778_v44 }
 0xdf9   :  { %v490_v43 = vpop.permute.xlu1 %489 }
 0xdfa   :  { %v492_v45 = vmul.f32 %v738_v35, %v490_v43 }
 0xdfc   :  { %522 = vperm.xlu1 %679, %v492_v45   ;;  %516 = vperm.xlu0 %678, %v492_v45  }
 0xe00   :  { %680 = vset.pattern.permute.xlu1 %v781_v49  ;;  %682 = vset.pattern.permute.xlu0 %v778_v44 }
 0xe01   :  { %528 = vperm.xlu1 %680, %v492_v45  }
 0xe05   :  { %681 = vset.pattern.permute.xlu1 %v780_v46 }
 0xe0a   :  { %v504_v48 = vpop.permute.xlu1 %503 }
 0xe0b   :  { %v506_v51 = vmul.f32 %v504_v48, %v842_v14 }
 0xe0d   :  { %v507_v53 = vadd.f32 %v506_v51, %v501_v2 }
 0xe0f   :  { %v510_v52 = vpop.permute.xlu1 %509 }
 0xe10   :  { %v512_v54 = vmul.f32 %v510_v52, %v845_v15 }
 0xe12   :  { %v513_v57 = vadd.f32 %v512_v54, %v507_v53 }
 0xe7b   :  { %v517_v55 = vpop.permute.xlu0 %516  ;;  %v523_v56 = vpop.permute.xlu1 %522 }
 0xe7c   :  { %v519_v44 = vmul.f32 %v517_v55, %v853_v18  ;;  %v525_v46 = vmul.f32 %v523_v56, %v859_v23 }
 0xe7e   :  { %v520_v58 = vadd.f32 %v519_v44, %v513_v57 }
 0xe80   :  { %v526_v59 = vadd.f32 %v525_v46, %v520_v58  ;;  %v529_v60 = vpop.permute.xlu1 %528 }
 0xe81   :  { %v531_v8 = vmul.f32 %v529_v60, %v863_v26 }
 0xe83   :  { %v532_v61 = vadd.f32 %v531_v8, %v526_v59 }
 0xe85   :  { %741 = vtanh.f32 %v532_v61  ;;  %v625_v14 = vmul.f32 -1.442695, %v532_v61 }
 0xe87   :  { %743 = vpow2.f32 %v625_v14 }
 0xe8f   :  { %v742_v16 = vpop.eup %741 }
 0xe90   :  { %542 = vrot.lane.b32.xlu0 %v742_v16, %s776_s2 }
 0xe91   :  { %v744_v15 = vpop.eup %743 }
 0xe92   :  { %v536_v62 = vadd.f32 1.0, %v744_v15 }
 0xe94   :  { %745 = vrcp.f32 %v536_v62 }
 0xe9e   :  { %v746_v63 = vpop.eup %745 }
 0xe9f   :  { %v540_v23 = vmul.f32 %v746_v63, %v486_v41 }
 0xf02   :  { %v543_v0 = vpop.permute.xlu0 %542 }
 0xf03   :  { %v545_v18 = vmul.f32 %v746_v63, %v543_v0 }
 0xf05   :  { %547 = vrot.lane.b32.xlu1 %v545_v18, %s777_s3 }
 0xf77   :  { %v548_v4 = vpop.permute.xlu1 %547 }
 0xf78   :  { %v550_v5 = vadd.f32 %v548_v4, %v540_v23 }
 0xf7a   :  { %747 = vtanh.f32 %v550_v5 }
 0xf84   :  { %v748_v26 = vpop.eup %747 }
 0xf85   :  { %553 = vrot.lane.b32.xlu0 %v748_v26, %s779_s30 }
 0xff7   :  { %v554_v7 = vpop.permute.xlu0 %553 }
 0xff8   :  { %v556_v11 = vmul.f32 %v746_v63, %v554_v7 }
 0xffa   :  { %575 = vperm.xlu0 %682, %v556_v11   ;;  %565 = vperm.xlu1 %681, %v556_v11  }
 0xffe   :  { %683 = vset.pattern.permute.xlu1 %v781_v49  ;;  %684 = vset.pattern.permute.xlu0 %v781_v49 }
 0xfff   :  { %585 = vperm.xlu1 %683, %v556_v11  }
0x1079   :  { %v576_v19 = vpop.permute.xlu0 %575  ;;  %v566_v21 = vpop.permute.xlu1 %565 }
0x107a   :  { %v572_v22 = vmul.f32 %v571_v13, %v566_v21  ;;  %v582_v1 = vmul.f32 %v581_v17, %v576_v19 }
0x107c   :  { %v573_v49 = vadd.f32 %v626_v20, %v572_v22 }
0x107e   :  { %v583_v25 = vadd.f32 %v582_v1, %v573_v49  ;;  %v586_v3 = vpop.permute.xlu1 %585 }
0x107f   :  { %v592_v27 = vmul.f32 %v591_v24, %v586_v3 }
0x1081   :  { %v593_v6 = vadd.f32 %v592_v27, %v583_v25 }
0x1083   :  { %595 = vst.msk [vmem:[#allocation2] sm:$0x3] %vm594_vm0, %v593_v6 }
0x1084   :  { %760 = shalt.err (!%p757_p4)
}
0x1085   :  { %s761_s25 = scalar_lea.hbm %s1032_s6, 32 }
0x1086   :  { %p762_p5 = scmp.ne.s32.totalorder %s1032_s6, %s761_s25  ;;  %p765_p6 = scmp.lt.u32.totalorder %s761_s25, %s1032_s6 }
0x1088   :  { %p767_p7 = pnand %p765_p6, %p762_p5 }
0x108a   :  { %770 = shalt.err (!%p767_p7)
}
0x108b   :  { %605 = dma.vmem_to_hbm [thread:$0]  %s603_s23, 32, %s1032_s6, [#allocation3]  }
0x108c   :  { %771 = dma.done.wait [#allocation3], 32  }
0x108d   :  { %772 = vsyncadd [#allocation3], 4294967264 }
0x108e   :  { %609 = vsyncpa [#allocation3], 1 }

</bundles_post_ra>
